<compile_context>
chip_gen: v7x
topology: tpu7x:2x2x1
jax: 0.10.0
libtpu: 0.0.40
codegen_flags: <defaults>
</compile_context>

<pallas_src>
import jax
import jax.numpy as jnp
from jax.experimental import pallas as pl
from jax.experimental.pallas import tpu as pltpu

BN_EPS = 1e-5
_LANE = 128
_TILE_M_MAX = 512      # lane-dense tile width for the B*N axis
_FMA_MAX_CIN = 8       # layers this narrow use VPU broadcast-FMA instead of the MXU
_BF16_MIN_CIN = 128    # layers this wide feed the MXU bf16 operands (f32 accumulate)


def _round_up(x, m):
    return ((x + m - 1) // m) * m


def _vmem_limit_bytes(c_in, c_out, tile_m):
    # double-buffered streamed tiles + resident params, generous headroom; clamp to sane range.
    tile_bytes = 2 * (c_in + c_out) * tile_m * 4
    param_bytes = (c_out * c_in + 2 * c_in + 16 * c_out) * 4
    need = 2 * (tile_bytes + param_bytes) + (8 << 20)
    return int(min(max(need, 32 << 20), 64 << 20))


def _layer_pass_kernel(*, c_in, tile_m, m_valid, apply_bn_in, use_fma, use_bf16, needs_mask):
    """One tiled pass: [BN+ReLU of incoming pre-BN y] -> matmul W -> per-tile BN stats."""

    def kernel(*refs):
        if apply_bn_in:
            ss_ref, y_in_ref, w_ref, y_out_ref, stats_ref = refs
            scale = ss_ref[:, 0:1]          # (c_in, 1)
            shift = ss_ref[:, 1:2]          # (c_in, 1)
            a = jnp.maximum(y_in_ref[...] * scale + shift, 0.0)   # folded BN + ReLU
        else:
            y_in_ref, w_ref, y_out_ref, stats_ref = refs
            a = y_in_ref[...]

        w = w_ref[...]
        if use_fma:
            # Narrow-K layer: keep the VPU at full width instead of an almost-empty MXU pass.
            y = w[:, 0:1] * a[0:1, :]
            for k in range(1, c_in):
                y = y + w[:, k:k + 1] * a[k:k + 1, :]
        else:
            lhs = w
            rhs = a
            if use_bf16:
                lhs = lhs.astype(jnp.bfloat16)
                rhs = rhs.astype(jnp.bfloat16)
            y = jnp.dot(lhs, rhs, preferred_element_type=jnp.float32)   # (c_out, tile_m)

        y_out_ref[...] = y

        if needs_mask:
            col = (pl.program_id(0) * tile_m
                   + jax.lax.broadcasted_iota(jnp.int32, (1, tile_m), 1))
            ym = jnp.where(col < m_valid, y, 0.0)
        else:
            ym = y
        s1 = jnp.sum(ym, axis=1, keepdims=True)          # (c_out, 1)
        s2 = jnp.sum(ym * ym, axis=1, keepdims=True)     # (c_out, 1)
        stats_ref[0] = jnp.concatenate([s1, s2], axis=1)  # (c_out, 2)

    return kernel


def _final_bn_relu_kernel(ss_ref, y_ref, o_ref):
    scale = ss_ref[:, 0:1]
    shift = ss_ref[:, 1:2]
    o_ref[...] = jnp.maximum(y_ref[...] * scale + shift, 0.0)


def _resident_spec(shape):
    # Constant-index param block; small, stays resident across the grid.
    return pl.BlockSpec(shape, lambda t: (0,) * len(shape))


def _run_layer_pass(y_in, w, ss_in, *, m_valid, tile_m):
    """y_in: (c_in, m_pad) previous layer's pre-BN activations (or the raw input when ss_in is
    None).  Returns (y_out (c_out, m_pad) pre-BN, s1 (c_out,), s2 (c_out,))."""
    c_out, c_in = w.shape
    m_pad = y_in.shape[1]
    num_tiles = m_pad // tile_m
    apply_bn_in = ss_in is not None
    use_fma = c_in <= _FMA_MAX_CIN
    use_bf16 = (not use_fma) and (c_in >= _BF16_MIN_CIN)

    kernel = _layer_pass_kernel(
        c_in=c_in, tile_m=tile_m, m_valid=m_valid, apply_bn_in=apply_bn_in,
        use_fma=use_fma, use_bf16=use_bf16, needs_mask=(m_pad != m_valid))

    in_specs = []
    args = []
    if apply_bn_in:
        in_specs.append(_resident_spec((c_in, 2)))
        args.append(ss_in)
    in_specs.append(pl.BlockSpec((c_in, tile_m), lambda t: (0, t)))
    args.append(y_in)
    in_specs.append(_resident_spec((c_out, c_in)))
    args.append(w.astype(jnp.bfloat16) if use_bf16 else w)

    y_out, stats = pl.pallas_call(
        kernel,
        grid=(num_tiles,),
        in_specs=in_specs,
        out_specs=(
            pl.BlockSpec((c_out, tile_m), lambda t: (0, t)),
            pl.BlockSpec((1, c_out, 2), lambda t: (t, 0, 0)),
        ),
        out_shape=(
            jax.ShapeDtypeStruct((c_out, m_pad), jnp.float32),
            jax.ShapeDtypeStruct((num_tiles, c_out, 2), jnp.float32),
        ),
        compiler_params=pltpu.CompilerParams(
            dimension_semantics=("parallel",),
            vmem_limit_bytes=_vmem_limit_bytes(c_in, c_out, tile_m)),
    )(*args)

    s = jnp.sum(stats, axis=0)        # (c_out, 2) cross-tile reduction (tiny, wrapper-side)
    return y_out, s[:, 0], s[:, 1]


def _run_final_bn_relu(y_in, ss, *, tile_m):
    c, m_pad = y_in.shape
    num_tiles = m_pad // tile_m
    return pl.pallas_call(
        _final_bn_relu_kernel,
        grid=(num_tiles,),
        in_specs=[_resident_spec((c, 2)),
                  pl.BlockSpec((c, tile_m), lambda t: (0, t))],
        out_specs=pl.BlockSpec((c, tile_m), lambda t: (0, t)),
        out_shape=jax.ShapeDtypeStruct((c, m_pad), jnp.float32),
        compiler_params=pltpu.CompilerParams(
            dimension_semantics=("parallel",),
            vmem_limit_bytes=_vmem_limit_bytes(c, c, tile_m)),
    )(ss, y_in)


def _bn_scale_shift(s1, s2, gamma, beta, m_valid):
    inv_m = 1.0 / float(m_valid)
    mean = s1 * inv_m
    var = jnp.maximum(s2 * inv_m - mean * mean, 0.0)   # clamp: one-pass cancellation guard
    scale = gamma * jax.lax.rsqrt(var + BN_EPS)
    shift = beta - mean * scale
    return jnp.stack([scale, shift], axis=1).astype(jnp.float32)   # (C, 2)


def pointnet_cloud_encoder(x_bcn, params):
    """x_bcn: (B, init_n_channels, N) float32, PyTorch NCW convention.
    params: list of (weight (C_out, C_in), gamma (C_out,), beta (C_out,)) per layer.
    Returns (B, n_features[-1], N) float32 (train-mode BatchNorm forward)."""
    b, c_in0, n = x_bcn.shape
    m = b * n
    tile_m = _TILE_M_MAX if m >= _TILE_M_MAX else _round_up(m, _LANE)
    m_pad = _round_up(m, tile_m)

    # NCW -> lane-dense channels-major (C_in, B*N); negligible HBM traffic (C_in is tiny).
    x2 = jnp.transpose(x_bcn.astype(jnp.float32), (1, 0, 2)).reshape(c_in0, m)
    if m_pad != m:
        x2 = jnp.pad(x2, ((0, 0), (0, m_pad - m)))

    act = x2
    ss = None
    for w, gamma, beta in params:
        y, s1, s2 = _run_layer_pass(act, w.astype(jnp.float32), ss, m_valid=m, tile_m=tile_m)
        ss = _bn_scale_shift(s1, s2, gamma.astype(jnp.float32), beta.astype(jnp.float32), m)
        act = y

    out2 = _run_final_bn_relu(act, ss, tile_m=tile_m)            # (c_last, m_pad), lane-dense
    c_last = act.shape[0]
    out2 = out2[:, :m].reshape(c_last, b, n)
    return jnp.transpose(out2, (1, 0, 2))                         # (B, C_last, N)


def make_params(key, init_n_channels, init_n_features, n_features):
    """Deterministic synthetic parameters matching PointNetCloudEncoder.__init__ shapes."""
    dims = [init_n_channels, init_n_features] + list(n_features)
    params = []
    for i in range(len(dims) - 1):
        c_in, c_out = dims[i], dims[i + 1]
        key, kw, kg, kb = jax.random.split(key, 4)
        bound = 1.0 / jnp.sqrt(jnp.float32(c_in))
        w = jax.random.uniform(kw, (c_out, c_in), jnp.float32, -bound, bound)
        gamma = jax.random.uniform(kg, (c_out,), jnp.float32, 0.5, 1.5)
        beta = jax.random.uniform(kb, (c_out,), jnp.float32, -0.1, 0.1)
        params.append((w, gamma, beta))
    return params


def reference_encoder(x_bcn, params):
    """Pure-JAX reference of the PyTorch forward (train-mode BN)."""
    x = x_bcn
    for w, gamma, beta in params:
        y = jnp.einsum("oc,bcn->bon", w, x)                     # SharedDot, n_channels=1
        mean = jnp.mean(y, axis=(0, 2), keepdims=True)
        var = jnp.mean((y - mean) ** 2, axis=(0, 2), keepdims=True)
        y = (y - mean) / jnp.sqrt(var + BN_EPS)
        y = y * gamma[None, :, None] + beta[None, :, None]
        x = jnp.maximum(y, 0.0)
    return x


if __name__ == "__main__":
    # Small, module-consistent shapes: batch=2, init_n_channels=4, 128 points,
    # init_n_features=32, n_features=[32, 64].
    init_n_channels, init_n_features, n_features = 4, 32, [32, 64]
    B, N = 2, 128

    key = jax.random.PRNGKey(0)
    kx, kp = jax.random.split(key)
    x = jax.random.normal(kx, (B, init_n_channels, N), jnp.float32)
    params = make_params(kp, init_n_channels, init_n_features, n_features)

    encode = jax.jit(pointnet_cloud_encoder)
    out = jax.block_until_ready(encode(x, params))

    ref = reference_encoder(x, params)
    assert out.shape == (B, n_features[-1], N), out.shape
    max_err = float(jnp.max(jnp.abs(out - ref)))
    assert jnp.allclose(out, ref, atol=1e-4, rtol=1e-4), max_err

    print("KERNEL_OK")
</pallas_src>

<mosaic_0001>
module attributes {stable_mosaic.version = 11 : i64} {
  func.func @kernel(%arg0: i32, %arg1: memref<4x256xf32, #tpu.memory_space<vmem>>, %arg2: memref<32x4xf32, #tpu.memory_space<vmem>>, %arg3: memref<32x256xf32, #tpu.memory_space<vmem>>, %arg4: memref<1x32x2xf32, #tpu.memory_space<vmem>>) attributes {dimension_semantics = [#tpu.dimension_semantics<parallel>], iteration_bounds = array<i64: 1>, scalar_prefetch = 0 : i64, scratch_operands = 0 : i64, tpu.core_type = #tpu.core_type<tc>, window_params = [{transform_indices = @transform_0, window_bounds = array<i64: 4, 256>}, {pipeline_mode = #tpu.pipeline_mode<synchronous>, transform_indices = @transform_1, window_bounds = array<i64: 32, 4>}, {transform_indices = @transform_2, window_bounds = array<i64: 32, 256>}, {transform_indices = @transform_3, window_bounds = array<i64: 1, 32, 2>}]} {
    %c0 = arith.constant 0 : index
    %c0_0 = arith.constant 0 : index
    %0 = vector.load %arg1[%c0, %c0_0] : memref<4x256xf32, #tpu.memory_space<vmem>>, vector<4x256xf32>
    %c0_1 = arith.constant 0 : index
    %c0_2 = arith.constant 0 : index
    %1 = vector.load %arg2[%c0_1, %c0_2] : memref<32x4xf32, #tpu.memory_space<vmem>>, vector<32x4xf32>
    %2 = vector.extract_strided_slice %1 {offsets = [0, 0], sizes = [32, 1], strides = [1, 1]} : vector<32x4xf32> to vector<32x1xf32>
    %3 = vector.extract_strided_slice %0 {offsets = [0, 0], sizes = [1, 256], strides = [1, 1]} : vector<4x256xf32> to vector<1x256xf32>
    %4 = vector.broadcast %2 : vector<32x1xf32> to vector<32x256xf32>
    %5 = vector.broadcast %3 : vector<1x256xf32> to vector<32x256xf32>
    %6 = arith.mulf %4, %5 : vector<32x256xf32>
    %7 = vector.extract_strided_slice %1 {offsets = [0, 1], sizes = [32, 1], strides = [1, 1]} : vector<32x4xf32> to vector<32x1xf32>
    %8 = vector.extract_strided_slice %0 {offsets = [1, 0], sizes = [1, 256], strides = [1, 1]} : vector<4x256xf32> to vector<1x256xf32>
    %9 = vector.broadcast %7 : vector<32x1xf32> to vector<32x256xf32>
    %10 = vector.broadcast %8 : vector<1x256xf32> to vector<32x256xf32>
    %11 = arith.mulf %9, %10 : vector<32x256xf32>
    %12 = arith.addf %6, %11 : vector<32x256xf32>
    %13 = vector.extract_strided_slice %1 {offsets = [0, 2], sizes = [32, 1], strides = [1, 1]} : vector<32x4xf32> to vector<32x1xf32>
    %14 = vector.extract_strided_slice %0 {offsets = [2, 0], sizes = [1, 256], strides = [1, 1]} : vector<4x256xf32> to vector<1x256xf32>
    %15 = vector.broadcast %13 : vector<32x1xf32> to vector<32x256xf32>
    %16 = vector.broadcast %14 : vector<1x256xf32> to vector<32x256xf32>
    %17 = arith.mulf %15, %16 : vector<32x256xf32>
    %18 = arith.addf %12, %17 : vector<32x256xf32>
    %19 = vector.extract_strided_slice %1 {offsets = [0, 3], sizes = [32, 1], strides = [1, 1]} : vector<32x4xf32> to vector<32x1xf32>
    %20 = vector.extract_strided_slice %0 {offsets = [3, 0], sizes = [1, 256], strides = [1, 1]} : vector<4x256xf32> to vector<1x256xf32>
    %21 = vector.broadcast %19 : vector<32x1xf32> to vector<32x256xf32>
    %22 = vector.broadcast %20 : vector<1x256xf32> to vector<32x256xf32>
    %23 = arith.mulf %21, %22 : vector<32x256xf32>
    %24 = arith.addf %18, %23 : vector<32x256xf32>
    %c0_3 = arith.constant 0 : index
    %c0_4 = arith.constant 0 : index
    %25 = vector.load %arg3[%c0_3, %c0_4] : memref<32x256xf32, #tpu.memory_space<vmem>>, vector<32x256xf32>
    tpu.vector_store %arg3[%c0_3, %c0_4], %24 {strides = array<i32>} : memref<32x256xf32, #tpu.memory_space<vmem>>, vector<32x256xf32>,
    %cst = arith.constant dense<0.000000e+00> : vector<32xf32>
    %26 = vector.multi_reduction <add>, %24, %cst [1] : vector<32x256xf32> to vector<32xf32>
    %27 = vector.shape_cast %26 : vector<32xf32> to vector<32x1xf32>
    %28 = arith.mulf %24, %24 : vector<32x256xf32>
    %cst_5 = arith.constant dense<0.000000e+00> : vector<32xf32>
    %29 = vector.multi_reduction <add>, %28, %cst_5 [1] : vector<32x256xf32> to vector<32xf32>
    %30 = vector.shape_cast %29 : vector<32xf32> to vector<32x1xf32>
    %31 = tpu.concatenate %27, %30 in 1 : vector<32x1xf32>, vector<32x1xf32> -> vector<32x2xf32>
    %c0_6 = arith.constant 0 : index
    %c0_7 = arith.constant 0 : index
    %c0_8 = arith.constant 0 : index
    %32 = vector.load %arg4[%c0_6, %c0_7, %c0_8] : memref<1x32x2xf32, #tpu.memory_space<vmem>>, vector<1x32x2xf32>
    %33 = vector.shape_cast %32 : vector<1x32x2xf32> to vector<32x2xf32>
    %34 = vector.shape_cast %31 : vector<32x2xf32> to vector<1x32x2xf32>
    tpu.vector_store %arg4[%c0_6, %c0_7, %c0_8], %34 {strides = array<i32>} : memref<1x32x2xf32, #tpu.memory_space<vmem>>, vector<1x32x2xf32>,
    return
  }
  func.func @transform_0(%arg0: i32) -> (i32, i32) {
    %c0_i32 = arith.constant 0 : i32
    %c0_i32_0 = arith.constant 0 : i32
    return %c0_i32, %arg0 : i32, i32
  }
  func.func @transform_1(%arg0: i32) -> (i32, i32) {
    %c0_i32 = arith.constant 0 : i32
    %c0_i32_0 = arith.constant 0 : i32
    %c0_i32_1 = arith.constant 0 : i32
    return %c0_i32, %c0_i32_0 : i32, i32
  }
  func.func @transform_2(%arg0: i32) -> (i32, i32) {
    %c0_i32 = arith.constant 0 : i32
    %c0_i32_0 = arith.constant 0 : i32
    return %c0_i32, %arg0 : i32, i32
  }
  func.func @transform_3(%arg0: i32) -> (i32, i32, i32) {
    %c0_i32 = arith.constant 0 : i32
    %c0_i32_0 = arith.constant 0 : i32
    %c0_i32_1 = arith.constant 0 : i32
    return %arg0, %c0_i32, %c0_i32_0 : i32, i32, i32
  }
}

module attributes {stable_mosaic.version = 11 : i64} {
  func.func @kernel(%arg0: i32, %arg1: memref<32x2xf32, #tpu.memory_space<vmem>>, %arg2: memref<32x256xf32, #tpu.memory_space<vmem>>, %arg3: memref<64x32xf32, #tpu.memory_space<vmem>>, %arg4: memref<64x256xf32, #tpu.memory_space<vmem>>, %arg5: memref<1x64x2xf32, #tpu.memory_space<vmem>>) attributes {dimension_semantics = [#tpu.dimension_semantics<parallel>], iteration_bounds = array<i64: 1>, scalar_prefetch = 0 : i64, scratch_operands = 0 : i64, tpu.core_type = #tpu.core_type<tc>, window_params = [{pipeline_mode = #tpu.pipeline_mode<synchronous>, transform_indices = @transform_0, window_bounds = array<i64: 32, 2>}, {transform_indices = @transform_1, window_bounds = array<i64: 32, 256>}, {pipeline_mode = #tpu.pipeline_mode<synchronous>, transform_indices = @transform_2, window_bounds = array<i64: 64, 32>}, {transform_indices = @transform_3, window_bounds = array<i64: 64, 256>}, {transform_indices = @transform_4, window_bounds = array<i64: 1, 64, 2>}]} {
    %c0 = arith.constant 0 : index
    %c0_0 = arith.constant 0 : index
    %0 = vector.load %arg1[%c0, %c0_0] : memref<32x2xf32, #tpu.memory_space<vmem>>, vector<32x1xf32>
    %c0_1 = arith.constant 0 : index
    %c1 = arith.constant 1 : index
    %1 = vector.load %arg1[%c0_1, %c1] : memref<32x2xf32, #tpu.memory_space<vmem>>, vector<32x1xf32>
    %c0_2 = arith.constant 0 : index
    %c0_3 = arith.constant 0 : index
    %2 = vector.load %arg2[%c0_2, %c0_3] : memref<32x256xf32, #tpu.memory_space<vmem>>, vector<32x256xf32>
    %3 = vector.broadcast %0 : vector<32x1xf32> to vector<32x256xf32>
    %4 = arith.mulf %2, %3 : vector<32x256xf32>
    %5 = vector.broadcast %1 : vector<32x1xf32> to vector<32x256xf32>
    %6 = arith.addf %4, %5 : vector<32x256xf32>
    %cst = arith.constant 0.000000e+00 : f32
    %7 = vector.broadcast %cst : f32 to vector<32x256xf32>
    %8 = arith.maximumf %6, %7 : vector<32x256xf32>
    %c0_4 = arith.constant 0 : index
    %c0_5 = arith.constant 0 : index
    %9 = vector.load %arg3[%c0_4, %c0_5] : memref<64x32xf32, #tpu.memory_space<vmem>>, vector<64x32xf32>
    %cst_6 = arith.constant dense<0.000000e+00> : vector<64x256xf32>
    %10 = tpu.matmul %9, %8, %cst_6 {dimension_numbers = #tpu.dot_dimension_numbers<[1], [0], [0], [1], [0, 0, 1, 1], [], []>} : vector<64x32xf32>, vector<32x256xf32>, vector<64x256xf32> -> vector<64x256xf32>
    %c0_7 = arith.constant 0 : index
    %c0_8 = arith.constant 0 : index
    %11 = vector.load %arg4[%c0_7, %c0_8] : memref<64x256xf32, #tpu.memory_space<vmem>>, vector<64x256xf32>
    tpu.vector_store %arg4[%c0_7, %c0_8], %10 {strides = array<i32>} : memref<64x256xf32, #tpu.memory_space<vmem>>, vector<64x256xf32>,
    %cst_9 = arith.constant dense<0.000000e+00> : vector<64xf32>
    %12 = vector.multi_reduction <add>, %10, %cst_9 [1] : vector<64x256xf32> to vector<64xf32>
    %13 = vector.shape_cast %12 : vector<64xf32> to vector<64x1xf32>
    %14 = arith.mulf %10, %10 : vector<64x256xf32>
    %cst_10 = arith.constant dense<0.000000e+00> : vector<64xf32>
    %15 = vector.multi_reduction <add>, %14, %cst_10 [1] : vector<64x256xf32> to vector<64xf32>
    %16 = vector.shape_cast %15 : vector<64xf32> to vector<64x1xf32>
    %17 = tpu.concatenate %13, %16 in 1 : vector<64x1xf32>, vector<64x1xf32> -> vector<64x2xf32>
    %c0_11 = arith.constant 0 : index
    %c0_12 = arith.constant 0 : index
    %c0_13 = arith.constant 0 : index
    %18 = vector.load %arg5[%c0_11, %c0_12, %c0_13] : memref<1x64x2xf32, #tpu.memory_space<vmem>>, vector<1x64x2xf32>
    %19 = vector.shape_cast %18 : vector<1x64x2xf32> to vector<64x2xf32>
    %20 = vector.shape_cast %17 : vector<64x2xf32> to vector<1x64x2xf32>
    tpu.vector_store %arg5[%c0_11, %c0_12, %c0_13], %20 {strides = array<i32>} : memref<1x64x2xf32, #tpu.memory_space<vmem>>, vector<1x64x2xf32>,
    return
  }
  func.func @transform_0(%arg0: i32) -> (i32, i32) {
    %c0_i32 = arith.constant 0 : i32
    %c0_i32_0 = arith.constant 0 : i32
    %c0_i32_1 = arith.constant 0 : i32
    return %c0_i32, %c0_i32_0 : i32, i32
  }
  func.func @transform_1(%arg0: i32) -> (i32, i32) {
    %c0_i32 = arith.constant 0 : i32
    %c0_i32_0 = arith.constant 0 : i32
    return %c0_i32, %arg0 : i32, i32
  }
  func.func @transform_2(%arg0: i32) -> (i32, i32) {
    %c0_i32 = arith.constant 0 : i32
    %c0_i32_0 = arith.constant 0 : i32
    %c0_i32_1 = arith.constant 0 : i32
    return %c0_i32, %c0_i32_0 : i32, i32
  }
  func.func @transform_3(%arg0: i32) -> (i32, i32) {
    %c0_i32 = arith.constant 0 : i32
    %c0_i32_0 = arith.constant 0 : i32
    return %c0_i32, %arg0 : i32, i32
  }
  func.func @transform_4(%arg0: i32) -> (i32, i32, i32) {
    %c0_i32 = arith.constant 0 : i32
    %c0_i32_0 = arith.constant 0 : i32
    %c0_i32_1 = arith.constant 0 : i32
    return %arg0, %c0_i32, %c0_i32_0 : i32, i32, i32
  }
}

module attributes {stable_mosaic.version = 11 : i64} {
  func.func @kernel(%arg0: i32, %arg1: memref<32x2xf32, #tpu.memory_space<vmem>>, %arg2: memref<32x256xf32, #tpu.memory_space<vmem>>, %arg3: memref<32x32xf32, #tpu.memory_space<vmem>>, %arg4: memref<32x256xf32, #tpu.memory_space<vmem>>, %arg5: memref<1x32x2xf32, #tpu.memory_space<vmem>>) attributes {dimension_semantics = [#tpu.dimension_semantics<parallel>], iteration_bounds = array<i64: 1>, scalar_prefetch = 0 : i64, scratch_operands = 0 : i64, tpu.core_type = #tpu.core_type<tc>, window_params = [{pipeline_mode = #tpu.pipeline_mode<synchronous>, transform_indices = @transform_0, window_bounds = array<i64: 32, 2>}, {transform_indices = @transform_1, window_bounds = array<i64: 32, 256>}, {pipeline_mode = #tpu.pipeline_mode<synchronous>, transform_indices = @transform_2, window_bounds = array<i64: 32, 32>}, {transform_indices = @transform_3, window_bounds = array<i64: 32, 256>}, {transform_indices = @transform_4, window_bounds = array<i64: 1, 32, 2>}]} {
    %c0 = arith.constant 0 : index
    %c0_0 = arith.constant 0 : index
    %0 = vector.load %arg1[%c0, %c0_0] : memref<32x2xf32, #tpu.memory_space<vmem>>, vector<32x1xf32>
    %c0_1 = arith.constant 0 : index
    %c1 = arith.constant 1 : index
    %1 = vector.load %arg1[%c0_1, %c1] : memref<32x2xf32, #tpu.memory_space<vmem>>, vector<32x1xf32>
    %c0_2 = arith.constant 0 : index
    %c0_3 = arith.constant 0 : index
    %2 = vector.load %arg2[%c0_2, %c0_3] : memref<32x256xf32, #tpu.memory_space<vmem>>, vector<32x256xf32>
    %3 = vector.broadcast %0 : vector<32x1xf32> to vector<32x256xf32>
    %4 = arith.mulf %2, %3 : vector<32x256xf32>
    %5 = vector.broadcast %1 : vector<32x1xf32> to vector<32x256xf32>
    %6 = arith.addf %4, %5 : vector<32x256xf32>
    %cst = arith.constant 0.000000e+00 : f32
    %7 = vector.broadcast %cst : f32 to vector<32x256xf32>
    %8 = arith.maximumf %6, %7 : vector<32x256xf32>
    %c0_4 = arith.constant 0 : index
    %c0_5 = arith.constant 0 : index
    %9 = vector.load %arg3[%c0_4, %c0_5] : memref<32x32xf32, #tpu.memory_space<vmem>>, vector<32x32xf32>
    %cst_6 = arith.constant dense<0.000000e+00> : vector<32x256xf32>
    %10 = tpu.matmul %9, %8, %cst_6 {dimension_numbers = #tpu.dot_dimension_numbers<[1], [0], [0], [1], [0, 0, 1, 1], [], []>} : vector<32x32xf32>, vector<32x256xf32>, vector<32x256xf32> -> vector<32x256xf32>
    %c0_7 = arith.constant 0 : index
    %c0_8 = arith.constant 0 : index
    %11 = vector.load %arg4[%c0_7, %c0_8] : memref<32x256xf32, #tpu.memory_space<vmem>>, vector<32x256xf32>
    tpu.vector_store %arg4[%c0_7, %c0_8], %10 {strides = array<i32>} : memref<32x256xf32, #tpu.memory_space<vmem>>, vector<32x256xf32>,
    %cst_9 = arith.constant dense<0.000000e+00> : vector<32xf32>
    %12 = vector.multi_reduction <add>, %10, %cst_9 [1] : vector<32x256xf32> to vector<32xf32>
    %13 = vector.shape_cast %12 : vector<32xf32> to vector<32x1xf32>
    %14 = arith.mulf %10, %10 : vector<32x256xf32>
    %cst_10 = arith.constant dense<0.000000e+00> : vector<32xf32>
    %15 = vector.multi_reduction <add>, %14, %cst_10 [1] : vector<32x256xf32> to vector<32xf32>
    %16 = vector.shape_cast %15 : vector<32xf32> to vector<32x1xf32>
    %17 = tpu.concatenate %13, %16 in 1 : vector<32x1xf32>, vector<32x1xf32> -> vector<32x2xf32>
    %c0_11 = arith.constant 0 : index
    %c0_12 = arith.constant 0 : index
    %c0_13 = arith.constant 0 : index
    %18 = vector.load %arg5[%c0_11, %c0_12, %c0_13] : memref<1x32x2xf32, #tpu.memory_space<vmem>>, vector<1x32x2xf32>
    %19 = vector.shape_cast %18 : vector<1x32x2xf32> to vector<32x2xf32>
    %20 = vector.shape_cast %17 : vector<32x2xf32> to vector<1x32x2xf32>
    tpu.vector_store %arg5[%c0_11, %c0_12, %c0_13], %20 {strides = array<i32>} : memref<1x32x2xf32, #tpu.memory_space<vmem>>, vector<1x32x2xf32>,
    return
  }
  func.func @transform_0(%arg0: i32) -> (i32, i32) {
    %c0_i32 = arith.constant 0 : i32
    %c0_i32_0 = arith.constant 0 : i32
    %c0_i32_1 = arith.constant 0 : i32
    return %c0_i32, %c0_i32_0 : i32, i32
  }
  func.func @transform_1(%arg0: i32) -> (i32, i32) {
    %c0_i32 = arith.constant 0 : i32
    %c0_i32_0 = arith.constant 0 : i32
    return %c0_i32, %arg0 : i32, i32
  }
  func.func @transform_2(%arg0: i32) -> (i32, i32) {
    %c0_i32 = arith.constant 0 : i32
    %c0_i32_0 = arith.constant 0 : i32
    %c0_i32_1 = arith.constant 0 : i32
    return %c0_i32, %c0_i32_0 : i32, i32
  }
  func.func @transform_3(%arg0: i32) -> (i32, i32) {
    %c0_i32 = arith.constant 0 : i32
    %c0_i32_0 = arith.constant 0 : i32
    return %c0_i32, %arg0 : i32, i32
  }
  func.func @transform_4(%arg0: i32) -> (i32, i32, i32) {
    %c0_i32 = arith.constant 0 : i32
    %c0_i32_0 = arith.constant 0 : i32
    %c0_i32_1 = arith.constant 0 : i32
    return %arg0, %c0_i32, %c0_i32_0 : i32, i32, i32
  }
}

module attributes {stable_mosaic.version = 11 : i64} {
  func.func @_final_bn_relu_kernel(%arg0: i32, %arg1: memref<64x2xf32, #tpu.memory_space<vmem>>, %arg2: memref<64x256xf32, #tpu.memory_space<vmem>>, %arg3: memref<64x256xf32, #tpu.memory_space<vmem>>) attributes {dimension_semantics = [#tpu.dimension_semantics<parallel>], iteration_bounds = array<i64: 1>, scalar_prefetch = 0 : i64, scratch_operands = 0 : i64, tpu.core_type = #tpu.core_type<tc>, window_params = [{pipeline_mode = #tpu.pipeline_mode<synchronous>, transform_indices = @transform_0, window_bounds = array<i64: 64, 2>}, {transform_indices = @transform_1, window_bounds = array<i64: 64, 256>}, {transform_indices = @transform_2, window_bounds = array<i64: 64, 256>}]} {
    %c0 = arith.constant 0 : index
    %c0_0 = arith.constant 0 : index
    %0 = vector.load %arg1[%c0, %c0_0] : memref<64x2xf32, #tpu.memory_space<vmem>>, vector<64x1xf32>
    %c0_1 = arith.constant 0 : index
    %c1 = arith.constant 1 : index
    %1 = vector.load %arg1[%c0_1, %c1] : memref<64x2xf32, #tpu.memory_space<vmem>>, vector<64x1xf32>
    %c0_2 = arith.constant 0 : index
    %c0_3 = arith.constant 0 : index
    %2 = vector.load %arg2[%c0_2, %c0_3] : memref<64x256xf32, #tpu.memory_space<vmem>>, vector<64x256xf32>
    %3 = vector.broadcast %0 : vector<64x1xf32> to vector<64x256xf32>
    %4 = arith.mulf %2, %3 : vector<64x256xf32>
    %5 = vector.broadcast %1 : vector<64x1xf32> to vector<64x256xf32>
    %6 = arith.addf %4, %5 : vector<64x256xf32>
    %cst = arith.constant 0.000000e+00 : f32
    %7 = vector.broadcast %cst : f32 to vector<64x256xf32>
    %8 = arith.maximumf %6, %7 : vector<64x256xf32>
    %c0_4 = arith.constant 0 : index
    %c0_5 = arith.constant 0 : index
    %9 = vector.load %arg3[%c0_4, %c0_5] : memref<64x256xf32, #tpu.memory_space<vmem>>, vector<64x256xf32>
    tpu.vector_store %arg3[%c0_4, %c0_5], %8 {strides = array<i32>} : memref<64x256xf32, #tpu.memory_space<vmem>>, vector<64x256xf32>,
    return
  }
  func.func @transform_0(%arg0: i32) -> (i32, i32) {
    %c0_i32 = arith.constant 0 : i32
    %c0_i32_0 = arith.constant 0 : i32
    %c0_i32_1 = arith.constant 0 : i32
    return %c0_i32, %c0_i32_0 : i32, i32
  }
  func.func @transform_1(%arg0: i32) -> (i32, i32) {
    %c0_i32 = arith.constant 0 : i32
    %c0_i32_0 = arith.constant 0 : i32
    return %c0_i32, %arg0 : i32, i32
  }
  func.func @transform_2(%arg0: i32) -> (i32, i32) {
    %c0_i32 = arith.constant 0 : i32
    %c0_i32_0 = arith.constant 0 : i32
    return %c0_i32, %arg0 : i32, i32
  }
}

</mosaic_0001>

<bundles_post_ra>
// kernel: pointnet_cloud_encoder.4
= control target key start
LH: loop header
LB: loop body
LE: loop exit
PB: predicated region body
PF: predicated region fallthrough
CT: control target
= control target key end

     0   :  { %v285_v0 = vmov 0   ;;  %v286_v5 = vmov 1   ;;  %v287_v6 = vmov 2   ;;  %v288_v7 = vmov 3   ;;  %s376_s1 = inlined_call_operand.vmem [shape: f32[32,4], index: 1, kind: input, shape index: {}]   ;;  %s377_s0 = inlined_call_operand.vmem [shape: f32[4,256], index: 0, kind: input, shape index: {}]   ;;  %s378_s2 = inlined_call_operand.vmem [shape: f32[32,256], index: 2, kind: output, shape index: {0}]   ;;  %s379_s3 = inlined_call_operand.vmem [shape: f32[1,32,2], index: 3, kind: output, shape index: {1}]  }
   0x1   :  { %278 = vset.pattern.permute.xlu1 %v285_v0  ;;  %277 = vset.pattern.permute.xlu0 %v285_v0  ;;  %v16_v1 = vld [vmem:[%s376_s1 + $0x10] sm:$0xff]  ;;  %v14_v2 = vld [vmem:[%s376_s1] sm:$0xff]  ;;  %v17_v3 = vld [vmem:[%s376_s1 + $0x18] sm:$0xff]  ;;  %v39_v8 = vlaneseq  ;;  %vm255_vm0 = vcmask 7168   ;;  %vm260_vm1 = vcmask 15360  }
   0x2   :  { %30 = vperm.xlu1 %278, %v16_v1   ;;  %20 = vperm.xlu0 %277, %v14_v2   ;;  %v15_v4 = vld [vmem:[%s376_s1 + $0x8] sm:$0xff]  ;;  %v13_v18 = vld [vmem:[%s377_s0] sm:$0xff] }
   0x3   :  { %v40_v11 = vshrl.u32 %v39_v8, 7 }
   0x5   :  { %v83_v14 = vsub.s32 1, %v40_v11  ;;  %v87_v15 = vsub.s32 5, %v40_v11  ;;  %v41_v16 = vsub.s32 0, %v40_v11  ;;  %v45_v17 = vsub.s32 4, %v40_v11 }
   0x6   :  { %35 = vperm.xlu1 %278, %v17_v3   ;;  %25 = vperm.xlu0 %277, %v15_v4   ;;  %v133_v19 = vsub.s32 2, %v40_v11  ;;  %v137_v20 = vsub.s32 6, %v40_v11  ;;  %v183_v29 = vsub.s32 3, %v40_v11  ;;  %v187_v30 = vsub.s32 7, %v40_v11 }
   0x7   :  { %v84_v23 = vrot.slane %v13_v18, %v83_v14  ;;  %v88_v24 = vrot.slane %v13_v18, %v87_v15  ;;  %v42_v25 = vrot.slane %v13_v18, %v41_v16  ;;  %v46_v26 = vrot.slane %v13_v18, %v45_v17 }
   0x8   :  { %v134_v27 = vrot.slane %v13_v18, %v133_v19  ;;  %v138_v28 = vrot.slane %v13_v18, %v137_v20  ;;  %v184_v39 = vrot.slane %v13_v18, %v183_v29  ;;  %v188_v40 = vrot.slane %v13_v18, %v187_v30 }
   0x9   :  { %v94_v33 = vrot.slane %v84_v23, %v83_v14  ;;  %v98_v34 = vrot.slane %v88_v24, %v83_v14  ;;  %v52_v35 = vrot.slane %v42_v25, %v41_v16  ;;  %v56_v36 = vrot.slane %v46_v26, %v41_v16 }
   0xa   :  { %280 = vset.pattern.permute.xlu1 %v286_v5  ;;  %279 = vset.pattern.permute.xlu0 %v286_v5  ;;  %v144_v37 = vrot.slane %v134_v27, %v133_v19  ;;  %v148_v38 = vrot.slane %v138_v28, %v133_v19  ;;  %v326_v49 = vrot.slane %v184_v39, %v183_v29 }
   0xb   :  { %70 = vperm.xlu1 %280, %v15_v4   ;;  %66 = vperm.xlu0 %279, %v14_v2   ;;  %v328_v50 = vrot.slane %v188_v40, %v183_v29 }
   0xf   :  { %74 = vperm.xlu1 %280, %v16_v1   ;;  %78 = vperm.xlu0 %279, %v17_v3  }
  0x13   :  { %281 = vset.pattern.permute.xlu1 %v287_v6  ;;  %282 = vset.pattern.permute.xlu0 %v287_v6 }
  0x14   :  { %116 = vperm.xlu1 %281, %v14_v2   ;;  %120 = vperm.xlu0 %282, %v15_v4  }
  0x18   :  { %124 = vperm.xlu1 %281, %v16_v1   ;;  %283 = vset.pattern.permute.xlu0 %v288_v7 }
  0x19   :  { %166 = vperm.xlu0 %283, %v14_v2  }
  0x1c   :  { %128 = vperm.xlu1 %281, %v17_v3  }
  0x1d   :  { %178 = vperm.xlu0 %283, %v17_v3  }
  0x20   :  { %284 = vset.pattern.permute.xlu1 %v288_v7 }
  0x21   :  { %170 = vperm.xlu1 %284, %v15_v4  }
  0x25   :  { %174 = vperm.xlu1 %284, %v16_v1  }
  0x81   :  { %v321_v9 = vpop.permute.xlu1 %30  ;;  %v21_v10 = vpop.permute.xlu0 %20 }
  0x82   :  { %v57_v41 = vmul.f32 %v52_v35, %v21_v10  ;;  %v58_v42 = vmul.f32 %v56_v36, %v21_v10 }
  0x85   :  { %v36_v12 = vpop.permute.xlu1 %35  ;;  %v26_v13 = vpop.permute.xlu0 %25 }
  0x86   :  { %v63_v55 = vmul.f32 %v52_v35, %v36_v12  ;;  %v64_v62 = vmul.f32 %v56_v36, %v36_v12  ;;  %v59_v63 = vmul.f32 %v52_v35, %v26_v13  ;;  %v60_v0 = vmul.f32 %v56_v36, %v26_v13 }
  0x8a   :  { %v71_v21 = vpop.permute.xlu1 %70  ;;  %v67_v22 = vpop.permute.xlu0 %66 }
  0x8b   :  { %v99_v43 = vmul.f32 %v94_v33, %v67_v22  ;;  %v100_v44 = vmul.f32 %v98_v34, %v67_v22  ;;  %v101_v1 = vmul.f32 %v94_v33, %v71_v21  ;;  %v102_v2 = vmul.f32 %v98_v34, %v71_v21 }
  0x8c   :  { %v61_v21 = vmul.f32 %v52_v35, %v321_v9  ;;  %v62_v22 = vmul.f32 %v56_v36, %v321_v9 }
  0x8d   :  { %v107_v51 = vadd.f32 %v99_v43, %v57_v41  ;;  %v108_v52 = vadd.f32 %v100_v44, %v58_v42  ;;  %v109_v23 = vadd.f32 %v101_v1, %v59_v63  ;;  %v110_v24 = vadd.f32 %v102_v2, %v60_v0 }
  0x8e   :  { %v75_v31 = vpop.permute.xlu1 %74  ;;  %v79_v32 = vpop.permute.xlu0 %78 }
  0x8f   :  { %v105_v53 = vmul.f32 %v94_v33, %v79_v32  ;;  %v106_v56 = vmul.f32 %v98_v34, %v79_v32  ;;  %v103_v17 = vmul.f32 %v94_v33, %v75_v31  ;;  %v104_v18 = vmul.f32 %v98_v34, %v75_v31 }
  0x91   :  { %v113_v3 = vadd.f32 %v105_v53, %v63_v55  ;;  %v114_v7 = vadd.f32 %v106_v56, %v64_v62  ;;  %v111_v33 = vadd.f32 %v103_v17, %v61_v21  ;;  %v112_v34 = vadd.f32 %v104_v18, %v62_v22 }
  0x93   :  { %v117_v45 = vpop.permute.xlu1 %116  ;;  %v121_v46 = vpop.permute.xlu0 %120 }
  0x94   :  { %v149_v47 = vmul.f32 %v144_v37, %v117_v45  ;;  %v150_v48 = vmul.f32 %v148_v38, %v117_v45  ;;  %v151_v8 = vmul.f32 %v144_v37, %v121_v46  ;;  %v152_v15 = vmul.f32 %v148_v38, %v121_v46 }
  0x96   :  { %v157_v58 = vadd.f32 %v149_v47, %v107_v51  ;;  %v158_v59 = vadd.f32 %v150_v48, %v108_v52  ;;  %v159_v30 = vadd.f32 %v151_v8, %v109_v23  ;;  %v160_v32 = vadd.f32 %v152_v15, %v110_v24 }
  0x97   :  { %v125_v54 = vpop.permute.xlu1 %124 }
  0x98   :  { %v167_v57 = vpop.permute.xlu0 %166  ;;  %v153_v25 = vmul.f32 %v144_v37, %v125_v54  ;;  %v154_v26 = vmul.f32 %v148_v38, %v125_v54 }
  0x99   :  { %v199_v60 = vmul.f32 %v326_v49, %v167_v57  ;;  %v200_v61 = vmul.f32 %v328_v50, %v167_v57 }
  0x9b   :  { %v207_v4 = vadd.f32 %v199_v60, %v157_v58  ;;  %v208_v5 = vadd.f32 %v200_v61, %v158_v59  ;;  %v129_v6 = vpop.permute.xlu1 %128 }
  0x9c   :  { %v155_v10 = vmul.f32 %v144_v37, %v129_v6  ;;  %v156_v11 = vmul.f32 %v148_v38, %v129_v6  ;;  %v179_v14 = vpop.permute.xlu0 %178  ;;  %v161_v37 = vadd.f32 %v153_v25, %v111_v33  ;;  %v162_v38 = vadd.f32 %v154_v26, %v112_v34 }
  0x9d   :  { %215 = vst [vmem:[%s378_s2] sm:$0xff] %v207_v4  ;;  %216 = vst [vmem:[%s378_s2 + $0x8] sm:$0xff] %v208_v5  ;;  %v205_v12 = vmul.f32 %v326_v49, %v179_v14  ;;  %v206_v13 = vmul.f32 %v328_v50, %v179_v14  ;;  %v223_v16 = vadd.f32 %v208_v5, %v207_v4 }
  0x9e   :  { %v163_v19 = vadd.f32 %v155_v10, %v113_v3  ;;  %v164_v20 = vadd.f32 %v156_v11, %v114_v7  ;;  %v235_v53 = vmul.f32 %v207_v4, %v207_v4 }
  0x9f   :  { %224 = vadd.xlane.f32.xlu1 %v223_v16 }
  0xa0   :  { %v213_v27 = vadd.f32 %v205_v12, %v163_v19  ;;  %v214_v28 = vadd.f32 %v206_v13, %v164_v20  ;;  %v171_v29 = vpop.permute.xlu1 %170 }
  0xa1   :  { %v201_v39 = vmul.f32 %v326_v49, %v171_v29  ;;  %v202_v31 = vmul.f32 %v328_v50, %v171_v29 }
  0xa2   :  { %221 = vst [vmem:[%s378_s2 + $0x30] sm:$0xff] %v213_v27  ;;  %222 = vst [vmem:[%s378_s2 + $0x38] sm:$0xff] %v214_v28  ;;  %v232_v9 = vadd.f32 %v214_v28, %v213_v27  ;;  %v241_v51 = vmul.f32 %v213_v27, %v213_v27  ;;  %v242_v52 = vmul.f32 %v214_v28, %v214_v28 }
  0xa3   :  { %v209_v35 = vadd.f32 %v201_v39, %v159_v30  ;;  %v210_v36 = vadd.f32 %v202_v31, %v160_v32 }
  0xa4   :  { %v175_v40 = vpop.permute.xlu1 %174  ;;  %233 = vadd.xlane.f32.xlu1 %v232_v9  ;;  %v252_v54 = vadd.f32 %v242_v52, %v241_v51 }
  0xa5   :  { %217 = vst [vmem:[%s378_s2 + $0x10] sm:$0xff] %v209_v35  ;;  %218 = vst [vmem:[%s378_s2 + $0x18] sm:$0xff] %v210_v36  ;;  %v203_v41 = vmul.f32 %v326_v49, %v175_v40  ;;  %v204_v42 = vmul.f32 %v328_v50, %v175_v40  ;;  %v226_v43 = vadd.f32 %v210_v36, %v209_v35 }
  0xa6   :  { %v237_v44 = vmul.f32 %v209_v35, %v209_v35  ;;  %v238_v45 = vmul.f32 %v210_v36, %v210_v36  ;;  %v236_v50 = vmul.f32 %v208_v5, %v208_v5 }
  0xa7   :  { %v211_v46 = vadd.f32 %v203_v41, %v161_v37  ;;  %v212_v47 = vadd.f32 %v204_v42, %v162_v38  ;;  %227 = vadd.xlane.f32.xlu0 %v226_v43 }
  0xa8   :  { %v246_v48 = vadd.f32 %v238_v45, %v237_v44  ;;  %v243_v55 = vadd.f32 %v236_v50, %v235_v53 }
  0xa9   :  { %219 = vst [vmem:[%s378_s2 + $0x20] sm:$0xff] %v211_v46  ;;  %220 = vst [vmem:[%s378_s2 + $0x28] sm:$0xff] %v212_v47  ;;  %v229_v49 = vadd.f32 %v212_v47, %v211_v46  ;;  %v239_v56 = vmul.f32 %v211_v46, %v211_v46  ;;  %v240_v57 = vmul.f32 %v212_v47, %v212_v47 }
  0xaa   :  { %247 = vadd.xlane.f32.xlu1 %v246_v48 }
  0xab   :  { %230 = vadd.xlane.f32.xlu0 %v229_v49  ;;  %v249_v58 = vadd.f32 %v240_v57, %v239_v56 }
  0xae   :  { %253 = vadd.xlane.f32.xlu1 %v252_v54 }
  0xaf   :  { %244 = vadd.xlane.f32.xlu0 %v243_v55 }
  0xb3   :  { %250 = vadd.xlane.f32.xlu0 %v249_v58 }
 0x12c   :  { %v225_v59 = vpop.xlane.xlu1 %224 }
 0x131   :  { %v234_v60 = vpop.xlane.xlu1 %233 }
 0x134   :  { %v228_v61 = vpop.xlane.xlu0 %227 }
 0x137   :  { %v248_v62 = vpop.xlane.xlu1 %247 }
 0x138   :  { %v257_v63 = vsel %vm255_vm0, %v228_v61, %v248_v62  ;;  %v231_v0 = vpop.xlane.xlu0 %230 }
 0x139   :  { %262 = vst.msk [vmem:[%s379_s3 + $0x8] sm:$0xff] %vm260_vm1, %v257_v63 }
 0x13b   :  { %v254_v1 = vpop.xlane.xlu1 %253 }
 0x13c   :  { %v259_v2 = vsel %vm255_vm0, %v234_v60, %v254_v1  ;;  %v245_v3 = vpop.xlane.xlu0 %244 }
 0x13d   :  { %264 = vst.msk [vmem:[%s379_s3 + $0x18] sm:$0xff] %vm260_vm1, %v259_v2  ;;  %v256_v4 = vsel %vm255_vm0, %v225_v59, %v245_v3 }
 0x13e   :  { %261 = vst.msk [vmem:[%s379_s3] sm:$0xff] %vm260_vm1, %v256_v4 }
 0x140   :  { %v251_v5 = vpop.xlane.xlu0 %250 }
 0x141   :  { %v258_v6 = vsel %vm255_vm0, %v231_v0, %v251_v5 }
 0x142   :  { %263 = vst.msk [vmem:[%s379_s3 + $0x10] sm:$0xff] %vm260_vm1, %v258_v6 }

// kernel: pointnet_cloud_encoder.5
= control target key start
LH: loop header
LB: loop body
LE: loop exit
PB: predicated region body
PF: predicated region fallthrough
CT: control target
= control target key end

     0   :  { %v276_v0 = vmov 1   ;;  %v277_v1 = vmov 0   ;;  %v278_v6 = vmov 0.0   ;;  %vm92_vm0 = vcmask 261120   ;;  %s388_s0 = inlined_call_operand.vmem [shape: f32[32,2], index: 0, kind: input, shape index: {}]   ;;  %s389_s1 = inlined_call_operand.vmem [shape: f32[32,256], index: 1, kind: input, shape index: {}]   ;;  %s390_s2 = inlined_call_operand.vmem [shape: f32[32,32], index: 2, kind: input, shape index: {}]   ;;  %s391_s3 = inlined_call_operand.vmem [shape: f32[32,256], index: 3, kind: output, shape index: {0}]   ;;  %s392_s4 = inlined_call_operand.vmem [shape: f32[1,32,2], index: 4, kind: output, shape index: {1}]  }
   0x1   :  { %272 = vset.pattern.permute.xlu1 %v276_v0  ;;  %271 = vset.pattern.permute.xlu0 %v277_v1  ;;  %v16_v2 = vld [vmem:[%s388_s0] sm:$0xff]  ;;  %v17_v3 = vld [vmem:[%s388_s0 + $0x8] sm:$0xff]  ;;  %v18_v4 = vld [vmem:[%s388_s0 + $0x10] sm:$0xff]  ;;  %vm234_vm1 = vcmask 7168   ;;  %vm239_vm2 = vcmask 15360  }
   0x2   :  { %57 = vperm.xlu1 %272, %v16_v2   ;;  %30 = vperm.xlu0 %271, %v16_v2   ;;  %v19_v5 = vld [vmem:[%s388_s0 + $0x18] sm:$0xff]  ;;  %v20_v7 = vld [vmem:[%s389_s1] sm:$0xff]  ;;  %v21_v8 = vld [vmem:[%s389_s1 + $0x8] sm:$0xff] }
   0x3   :  { %169 = vmatprep.mubr.f32.mxu0 %v278_v6  ;;  %181 = vmatprep.mubr.f32.mxu1 %v278_v6  ;;  %v22_v13 = vld [vmem:[%s389_s1 + $0x10] sm:$0xff]  ;;  %v23_v14 = vld [vmem:[%s389_s1 + $0x18] sm:$0xff]  ;;  %v24_v24 = vld [vmem:[%s389_s1 + $0x20] sm:$0xff] }
   0x4   :  { %v25_v25 = vld [vmem:[%s389_s1 + $0x28] sm:$0xff]  ;;  %v26_v31 = vld [vmem:[%s389_s1 + $0x30] sm:$0xff]  ;;  %v27_v32 = vld [vmem:[%s389_s1 + $0x38] sm:$0xff] }
   0x5   :  { %v88_v51 = vld [vmem:[%s390_s2] sm:$0xff]  ;;  %v90_v52 = vld [vmem:[%s390_s2 + $0x10] sm:$0xff]  ;;  %v91_v53 = vld [vmem:[%s390_s2 + $0x18] sm:$0xff] }
   0x6   :  { %61 = vperm.xlu1 %272, %v17_v3   ;;  %35 = vperm.xlu0 %271, %v17_v3   ;;  %v89_v54 = vld [vmem:[%s390_s2 + $0x8] sm:$0xff] }
   0xa   :  { %273 = vset.pattern.permute.xlu1 %v277_v1  ;;  %40 = vperm.xlu0 %271, %v18_v4  }
   0xb   :  { %45 = vperm.xlu1 %273, %v19_v5  }
   0xe   :  { %274 = vset.pattern.permute.xlu0 %v276_v0 }
   0xf   :  { %275 = vset.pattern.permute.xlu1 %v276_v0  ;;  %65 = vperm.xlu0 %274, %v18_v4  }
  0x10   :  { %69 = vperm.xlu1 %275, %v19_v5  }
  0x81   :  { %v58_v9 = vpop.permute.xlu1 %57  ;;  %v31_v10 = vpop.permute.xlu0 %30 }
  0x82   :  { %v48_v11 = vmul.f32 %v31_v10, %v20_v7  ;;  %v49_v12 = vmul.f32 %v31_v10, %v21_v8 }
  0x84   :  { %v72_v17 = vadd.f32 %v58_v9, %v48_v11  ;;  %v73_v18 = vadd.f32 %v58_v9, %v49_v12 }
  0x85   :  { %v62_v15 = vpop.permute.xlu1 %61  ;;  %v36_v16 = vpop.permute.xlu0 %35 }
  0x86   :  { %v50_v19 = vmul.f32 %v36_v16, %v22_v13  ;;  %v51_v20 = vmul.f32 %v36_v16, %v23_v14  ;;  %v81_v27 = vmax.f32 %v73_v18, 0.0  ;;  %v80_v29 = vmax.f32 %v72_v17, 0.0 }
  0x88   :  { %v74_v21 = vadd.f32 %v62_v15, %v50_v19  ;;  %v75_v22 = vadd.f32 %v62_v15, %v51_v20 }
  0x89   :  { %v41_v23 = vpop.permute.xlu0 %40 }
  0x8a   :  { %v46_v26 = vpop.permute.xlu1 %45  ;;  %v83_v28 = vmax.f32 %v75_v22, 0.0  ;;  %v82_v30 = vmax.f32 %v74_v21, 0.0  ;;  %v52_v35 = vmul.f32 %v41_v23, %v24_v24  ;;  %v53_v36 = vmul.f32 %v41_v23, %v25_v25 }
  0x8b   :  { %v54_v37 = vmul.f32 %v46_v26, %v26_v31  ;;  %v55_v38 = vmul.f32 %v46_v26, %v27_v32 }
  0x8c   :  { %v256_v33 = vpack.c.bf16 %v83_v28, %v81_v27  ;;  %v258_v34 = vpack.c.bf16 %v82_v30, %v80_v29 }
  0x8e   :  { %257 = vmatprep.subr.bf16.mxu0 %v256_v33  ;;  %264 = vmatprep.subr.bf16.mxu1 %v256_v33  ;;  %v66_v39 = vpop.permute.xlu0 %65 }
  0x8f   :  { %v76_v40 = vadd.f32 %v66_v39, %v52_v35  ;;  %v77_v41 = vadd.f32 %v66_v39, %v53_v36  ;;  %v70_v42 = vpop.permute.xlu1 %69  ;;  %259 = vmatpush1.bf16.msra.mxu0 %v258_v34  ;;  %266 = vmatpush1.bf16.msra.mxu1 %v258_v34 }
  0x90   :  { %v78_v43 = vadd.f32 %v70_v42, %v54_v37  ;;  %v79_v44 = vadd.f32 %v70_v42, %v55_v38 }
  0x91   :  { %v84_v45 = vmax.f32 %v76_v40, 0.0  ;;  %v85_v46 = vmax.f32 %v77_v41, 0.0 }
  0x92   :  { %v86_v47 = vmax.f32 %v78_v43, 0.0  ;;  %v87_v48 = vmax.f32 %v79_v44, 0.0 }
  0x94   :  { %v260_v49 = vpack.c.bf16 %v87_v48, %v85_v46  ;;  %v262_v50 = vpack.c.bf16 %v86_v47, %v84_v45 }
  0x96   :  { %261 = vmatprep.subr.bf16.mxu0 %v260_v49  ;;  %265 = vmatprep.subr.bf16.mxu1 %v260_v49 }
  0x97   :  { %263 = vmatpush1.bf16.msra.mxu0 %v262_v50  ;;  %267 = vmatpush1.bf16.msra.mxu1 %v262_v50 }
  0x9a   :  { %252 = vmatmul.mubr.msk.f32.vlgmr.msra.gmra.mrb[0].mxu0 %vm92_vm0, %v88_v51  ;;  %254 = vmatmul.mubr.msk.f32.vlgmr.msra.gmra.mrb[0].mxu1 %vm92_vm0, %v90_v52 }
  0x9b   :  { %187 = vmatprep.mubr.f32.mxu1 %v278_v6  ;;  %175 = vmatprep.mubr.f32.mxu0 %v278_v6 }
  0x9e   :  { %255 = vmatmul.mubr.msk.f32.gmra.mrb[2].mxu1 %vm92_vm0, %v91_v53  ;;  %253 = vmatmul.mubr.msk.f32.gmra.mrb[2].mxu0 %vm92_vm0, %v89_v54 }
 0x16d   :  { %v171_v55 = vpop.f32.mrb[0].mxu0  ;;  %v183_v56 = vpop.f32.mrb[0].mxu1 }
 0x16e   :  { %194 = vst [vmem:[%s391_s3] sm:$0xff] %v171_v55  ;;  %198 = vst [vmem:[%s391_s3 + $0x20] sm:$0xff] %v183_v56  ;;  %v173_v57 = vpop.f32.mrb[1].mxu0  ;;  %v185_v58 = vpop.f32.mrb[1].mxu1  ;;  %v214_v59 = vmul.f32 %v171_v55, %v171_v55  ;;  %v218_v60 = vmul.f32 %v183_v56, %v183_v56 }
 0x16f   :  { %195 = vst [vmem:[%s391_s3 + $0x8] sm:$0xff] %v173_v57  ;;  %199 = vst [vmem:[%s391_s3 + $0x28] sm:$0xff] %v185_v58  ;;  %v208_v61 = vadd.f32 %v185_v58, %v183_v56  ;;  %v202_v62 = vadd.f32 %v173_v57, %v171_v55  ;;  %v215_v63 = vmul.f32 %v173_v57, %v173_v57 }
 0x170   :  { %v219_v0 = vmul.f32 %v185_v58, %v185_v58 }
 0x171   :  { %209 = vadd.xlane.f32.xlu0 %v208_v61  ;;  %v189_v1 = vpop.f32.mrb[2].mxu1  ;;  %203 = vadd.xlane.f32.xlu1 %v202_v62  ;;  %v177_v2 = vpop.f32.mrb[2].mxu0  ;;  %v222_v3 = vadd.f32 %v215_v63, %v214_v59 }
 0x172   :  { %v228_v4 = vadd.f32 %v219_v0, %v218_v60  ;;  %200 = vst [vmem:[%s391_s3 + $0x30] sm:$0xff] %v189_v1  ;;  %196 = vst [vmem:[%s391_s3 + $0x10] sm:$0xff] %v177_v2  ;;  %v191_v5 = vpop.f32.mrb[3].mxu1  ;;  %v179_v6 = vpop.f32.mrb[3].mxu0  ;;  %v216_v7 = vmul.f32 %v177_v2, %v177_v2  ;;  %v220_v8 = vmul.f32 %v189_v1, %v189_v1 }
 0x173   :  { %201 = vst [vmem:[%s391_s3 + $0x38] sm:$0xff] %v191_v5  ;;  %v221_v9 = vmul.f32 %v191_v5, %v191_v5  ;;  %197 = vst [vmem:[%s391_s3 + $0x18] sm:$0xff] %v179_v6  ;;  %v217_v10 = vmul.f32 %v179_v6, %v179_v6  ;;  %v211_v11 = vadd.f32 %v191_v5, %v189_v1 }
 0x174   :  { %v205_v12 = vadd.f32 %v179_v6, %v177_v2 }
 0x175   :  { %223 = vadd.xlane.f32.xlu0 %v222_v3  ;;  %212 = vadd.xlane.f32.xlu1 %v211_v11  ;;  %v225_v13 = vadd.f32 %v217_v10, %v216_v7  ;;  %v231_v14 = vadd.f32 %v221_v9, %v220_v8 }
 0x179   :  { %226 = vadd.xlane.f32.xlu1 %v225_v13  ;;  %206 = vadd.xlane.f32.xlu0 %v205_v12 }
 0x17d   :  { %232 = vadd.xlane.f32.xlu1 %v231_v14  ;;  %229 = vadd.xlane.f32.xlu0 %v228_v4 }
 0x1fe   :  { %v210_v15 = vpop.xlane.xlu0 %209  ;;  %v204_v16 = vpop.xlane.xlu1 %203 }
 0x202   :  { %v224_v17 = vpop.xlane.xlu0 %223  ;;  %v213_v18 = vpop.xlane.xlu1 %212 }
 0x203   :  { %v235_v19 = vsel %vm234_vm1, %v204_v16, %v224_v17 }
 0x204   :  { %240 = vst.msk [vmem:[%s392_s4] sm:$0xff] %vm239_vm2, %v235_v19 }
 0x206   :  { %v227_v20 = vpop.xlane.xlu1 %226  ;;  %v207_v21 = vpop.xlane.xlu0 %206 }
 0x207   :  { %v236_v22 = vsel %vm234_vm1, %v207_v21, %v227_v20 }
 0x208   :  { %241 = vst.msk [vmem:[%s392_s4 + $0x8] sm:$0xff] %vm239_vm2, %v236_v22 }
 0x20a   :  { %v233_v23 = vpop.xlane.xlu1 %232  ;;  %v230_v24 = vpop.xlane.xlu0 %229 }
 0x20b   :  { %v238_v25 = vsel %vm234_vm1, %v213_v18, %v233_v23  ;;  %v237_v26 = vsel %vm234_vm1, %v210_v15, %v230_v24 }
 0x20c   :  { %243 = vst.msk [vmem:[%s392_s4 + $0x18] sm:$0xff] %vm239_vm2, %v238_v25  ;;  %242 = vst.msk [vmem:[%s392_s4 + $0x10] sm:$0xff] %vm239_vm2, %v237_v26 }

// kernel: pointnet_cloud_encoder.6
= control target key start
LH: loop header
LB: loop body
LE: loop exit
PB: predicated region body
PF: predicated region fallthrough
CT: control target
= control target key end

     0   :  { %v368_v0 = vmov 1   ;;  %v369_v1 = vmov 0   ;;  %v370_v6 = vmov 0.0   ;;  %vm96_vm0 = vcmask 261120   ;;  %s560_s0 = inlined_call_operand.vmem [shape: f32[32,2], index: 0, kind: input, shape index: {}]   ;;  %s561_s1 = inlined_call_operand.vmem [shape: f32[32,256], index: 1, kind: input, shape index: {}]   ;;  %s562_s2 = inlined_call_operand.vmem [shape: f32[64,32], index: 2, kind: input, shape index: {}]   ;;  %s563_s3 = inlined_call_operand.vmem [shape: f32[64,256], index: 3, kind: output, shape index: {0}]   ;;  %s564_s4 = inlined_call_operand.vmem [shape: f32[1,64,2], index: 4, kind: output, shape index: {1}]  }
   0x1   :  { %364 = vset.pattern.permute.xlu1 %v368_v0  ;;  %363 = vset.pattern.permute.xlu0 %v369_v1  ;;  %v16_v2 = vld [vmem:[%s560_s0] sm:$0xff]  ;;  %v17_v3 = vld [vmem:[%s560_s0 + $0x8] sm:$0xff]  ;;  %v18_v4 = vld [vmem:[%s560_s0 + $0x10] sm:$0xff]  ;;  %vm314_vm1 = vcmask 7168   ;;  %vm323_vm2 = vcmask 15360  }
   0x2   :  { %57 = vperm.xlu1 %364, %v16_v2   ;;  %30 = vperm.xlu0 %363, %v16_v2   ;;  %v19_v5 = vld [vmem:[%s560_s0 + $0x18] sm:$0xff]  ;;  %v20_v7 = vld [vmem:[%s561_s1] sm:$0xff]  ;;  %v21_v8 = vld [vmem:[%s561_s1 + $0x8] sm:$0xff] }
   0x3   :  { %185 = vmatprep.mubr.f32.mxu0 %v370_v6  ;;  %209 = vmatprep.mubr.f32.mxu1 %v370_v6  ;;  %v22_v13 = vld [vmem:[%s561_s1 + $0x10] sm:$0xff]  ;;  %v23_v14 = vld [vmem:[%s561_s1 + $0x18] sm:$0xff]  ;;  %v24_v24 = vld [vmem:[%s561_s1 + $0x20] sm:$0xff] }
   0x4   :  { %v25_v25 = vld [vmem:[%s561_s1 + $0x28] sm:$0xff]  ;;  %v26_v31 = vld [vmem:[%s561_s1 + $0x30] sm:$0xff]  ;;  %v27_v32 = vld [vmem:[%s561_s1 + $0x38] sm:$0xff] }
   0x5   :  { %v88_v51 = vld [vmem:[%s562_s2] sm:$0xff]  ;;  %v93_v53 = vld [vmem:[%s562_s2 + $0x28] sm:$0xff]  ;;  %v90_v55 = vld [vmem:[%s562_s2 + $0x10] sm:$0xff] }
   0x6   :  { %61 = vperm.xlu1 %364, %v17_v3   ;;  %35 = vperm.xlu0 %363, %v17_v3   ;;  %v92_v52 = vld [vmem:[%s562_s2 + $0x20] sm:$0xff]  ;;  %v89_v54 = vld [vmem:[%s562_s2 + $0x8] sm:$0xff]  ;;  %v94_v56 = vld [vmem:[%s562_s2 + $0x30] sm:$0xff] }
   0x7   :  { %v91_v57 = vld [vmem:[%s562_s2 + $0x18] sm:$0xff] }
   0x8   :  { %v95_v58 = vld [vmem:[%s562_s2 + $0x38] sm:$0xff] }
   0xa   :  { %365 = vset.pattern.permute.xlu1 %v369_v1  ;;  %40 = vperm.xlu0 %363, %v18_v4  }
   0xb   :  { %45 = vperm.xlu1 %365, %v19_v5  }
   0xe   :  { %366 = vset.pattern.permute.xlu0 %v368_v0 }
   0xf   :  { %367 = vset.pattern.permute.xlu1 %v368_v0  ;;  %65 = vperm.xlu0 %366, %v18_v4  }
  0x10   :  { %69 = vperm.xlu1 %367, %v19_v5  }
  0x81   :  { %v58_v9 = vpop.permute.xlu1 %57  ;;  %v31_v10 = vpop.permute.xlu0 %30 }
  0x82   :  { %v48_v11 = vmul.f32 %v31_v10, %v20_v7  ;;  %v49_v12 = vmul.f32 %v31_v10, %v21_v8 }
  0x84   :  { %v72_v17 = vadd.f32 %v58_v9, %v48_v11  ;;  %v73_v18 = vadd.f32 %v58_v9, %v49_v12 }
  0x85   :  { %v62_v15 = vpop.permute.xlu1 %61  ;;  %v36_v16 = vpop.permute.xlu0 %35 }
  0x86   :  { %v50_v19 = vmul.f32 %v36_v16, %v22_v13  ;;  %v51_v20 = vmul.f32 %v36_v16, %v23_v14  ;;  %v81_v27 = vmax.f32 %v73_v18, 0.0  ;;  %v80_v29 = vmax.f32 %v72_v17, 0.0 }
  0x88   :  { %v74_v21 = vadd.f32 %v62_v15, %v50_v19  ;;  %v75_v22 = vadd.f32 %v62_v15, %v51_v20 }
  0x89   :  { %v41_v23 = vpop.permute.xlu0 %40 }
  0x8a   :  { %v46_v26 = vpop.permute.xlu1 %45  ;;  %v83_v28 = vmax.f32 %v75_v22, 0.0  ;;  %v82_v30 = vmax.f32 %v74_v21, 0.0  ;;  %v52_v35 = vmul.f32 %v41_v23, %v24_v24  ;;  %v53_v36 = vmul.f32 %v41_v23, %v25_v25 }
  0x8b   :  { %v54_v37 = vmul.f32 %v46_v26, %v26_v31  ;;  %v55_v38 = vmul.f32 %v46_v26, %v27_v32 }
  0x8c   :  { %v348_v33 = vpack.c.bf16 %v83_v28, %v81_v27  ;;  %v350_v34 = vpack.c.bf16 %v82_v30, %v80_v29 }
  0x8e   :  { %349 = vmatprep.subr.bf16.mxu0 %v348_v33  ;;  %356 = vmatprep.subr.bf16.mxu1 %v348_v33  ;;  %v66_v39 = vpop.permute.xlu0 %65 }
  0x8f   :  { %v76_v40 = vadd.f32 %v66_v39, %v52_v35  ;;  %v77_v41 = vadd.f32 %v66_v39, %v53_v36  ;;  %v70_v42 = vpop.permute.xlu1 %69  ;;  %351 = vmatpush1.bf16.msra.mxu0 %v350_v34  ;;  %358 = vmatpush1.bf16.msra.mxu1 %v350_v34 }
  0x90   :  { %v78_v43 = vadd.f32 %v70_v42, %v54_v37  ;;  %v79_v44 = vadd.f32 %v70_v42, %v55_v38 }
  0x91   :  { %v84_v45 = vmax.f32 %v76_v40, 0.0  ;;  %v85_v46 = vmax.f32 %v77_v41, 0.0 }
  0x92   :  { %v86_v47 = vmax.f32 %v78_v43, 0.0  ;;  %v87_v48 = vmax.f32 %v79_v44, 0.0 }
  0x94   :  { %v352_v49 = vpack.c.bf16 %v87_v48, %v85_v46  ;;  %v354_v50 = vpack.c.bf16 %v86_v47, %v84_v45 }
  0x96   :  { %353 = vmatprep.subr.bf16.mxu0 %v352_v49  ;;  %357 = vmatprep.subr.bf16.mxu1 %v352_v49 }
  0x97   :  { %355 = vmatpush1.bf16.msra.mxu0 %v354_v50  ;;  %359 = vmatpush1.bf16.msra.mxu1 %v354_v50 }
  0x9a   :  { %340 = vmatmul.mubr.msk.f32.vlgmr.msra.gmra.mrb[0].mxu0 %vm96_vm0, %v88_v51  ;;  %344 = vmatmul.mubr.msk.f32.vlgmr.msra.gmra.mrb[0].mxu1 %vm96_vm0, %v92_v52 }
  0x9b   :  { %215 = vmatprep.mubr.f32.mxu1 %v370_v6  ;;  %191 = vmatprep.mubr.f32.mxu0 %v370_v6 }
  0x9e   :  { %345 = vmatmul.mubr.msk.f32.gmra.mrb[2].mxu1 %vm96_vm0, %v93_v53  ;;  %341 = vmatmul.mubr.msk.f32.gmra.mrb[2].mxu0 %vm96_vm0, %v89_v54 }
  0x9f   :  { %197 = vmatprep.mubr.f32.mxu0 %v370_v6  ;;  %221 = vmatprep.mubr.f32.mxu1 %v370_v6 }
  0xa2   :  { %342 = vmatmul.mubr.msk.f32.gmra.mrb[4].mxu0 %vm96_vm0, %v90_v55  ;;  %346 = vmatmul.mubr.msk.f32.gmra.mrb[4].mxu1 %vm96_vm0, %v94_v56 }
  0xa3   :  { %203 = vmatprep.mubr.f32.mxu0 %v370_v6  ;;  %227 = vmatprep.mubr.f32.mxu1 %v370_v6 }
  0xa6   :  { %343 = vmatmul.mubr.msk.f32.gmra.mrb[6].mxu0 %vm96_vm0, %v91_v57  ;;  %347 = vmatmul.mubr.msk.f32.gmra.mrb[6].mxu1 %vm96_vm0, %v95_v58 }
 0x16d   :  { %v187_v59 = vpop.f32.mrb[0].mxu0  ;;  %v211_v60 = vpop.f32.mrb[0].mxu1 }
 0x16e   :  { %234 = vst [vmem:[%s563_s3] sm:$0xff] %v187_v59  ;;  %242 = vst [vmem:[%s563_s3 + $0x40] sm:$0xff] %v211_v60  ;;  %v189_v61 = vpop.f32.mrb[1].mxu0  ;;  %v213_v62 = vpop.f32.mrb[1].mxu1  ;;  %v274_v63 = vmul.f32 %v187_v59, %v187_v59  ;;  %v282_v0 = vmul.f32 %v211_v60, %v211_v60 }
 0x16f   :  { %235 = vst [vmem:[%s563_s3 + $0x8] sm:$0xff] %v189_v61  ;;  %243 = vst [vmem:[%s563_s3 + $0x48] sm:$0xff] %v213_v62  ;;  %v262_v1 = vadd.f32 %v213_v62, %v211_v60  ;;  %v250_v2 = vadd.f32 %v189_v61, %v187_v59  ;;  %v275_v3 = vmul.f32 %v189_v61, %v189_v61 }
 0x170   :  { %v283_v4 = vmul.f32 %v213_v62, %v213_v62 }
 0x171   :  { %263 = vadd.xlane.f32.xlu0 %v262_v1  ;;  %v217_v5 = vpop.f32.mrb[2].mxu1  ;;  %251 = vadd.xlane.f32.xlu1 %v250_v2  ;;  %v193_v6 = vpop.f32.mrb[2].mxu0  ;;  %v290_v7 = vadd.f32 %v275_v3, %v274_v63 }
 0x172   :  { %v302_v8 = vadd.f32 %v283_v4, %v282_v0  ;;  %244 = vst [vmem:[%s563_s3 + $0x50] sm:$0xff] %v217_v5  ;;  %236 = vst [vmem:[%s563_s3 + $0x10] sm:$0xff] %v193_v6  ;;  %v219_v9 = vpop.f32.mrb[3].mxu1  ;;  %v195_v10 = vpop.f32.mrb[3].mxu0  ;;  %v276_v11 = vmul.f32 %v193_v6, %v193_v6  ;;  %v284_v12 = vmul.f32 %v217_v5, %v217_v5 }
 0x173   :  { %245 = vst [vmem:[%s563_s3 + $0x58] sm:$0xff] %v219_v9  ;;  %237 = vst [vmem:[%s563_s3 + $0x18] sm:$0xff] %v195_v10  ;;  %v265_v13 = vadd.f32 %v219_v9, %v217_v5  ;;  %v277_v14 = vmul.f32 %v195_v10, %v195_v10  ;;  %v285_v15 = vmul.f32 %v219_v9, %v219_v9 }
 0x174   :  { %v253_v16 = vadd.f32 %v195_v10, %v193_v6 }
 0x175   :  { %291 = vadd.xlane.f32.xlu0 %v290_v7  ;;  %266 = vadd.xlane.f32.xlu1 %v265_v13  ;;  %v199_v17 = vpop.f32.mrb[4].mxu0  ;;  %v293_v18 = vadd.f32 %v277_v14, %v276_v11  ;;  %v223_v19 = vpop.f32.mrb[4].mxu1  ;;  %v305_v20 = vadd.f32 %v285_v15, %v284_v12 }
 0x176   :  { %238 = vst [vmem:[%s563_s3 + $0x20] sm:$0xff] %v199_v17  ;;  %v201_v21 = vpop.f32.mrb[5].mxu0  ;;  %246 = vst [vmem:[%s563_s3 + $0x60] sm:$0xff] %v223_v19  ;;  %v225_v22 = vpop.f32.mrb[5].mxu1  ;;  %v278_v23 = vmul.f32 %v199_v17, %v199_v17  ;;  %v286_v24 = vmul.f32 %v223_v19, %v223_v19 }
 0x177   :  { %239 = vst [vmem:[%s563_s3 + $0x28] sm:$0xff] %v201_v21  ;;  %247 = vst [vmem:[%s563_s3 + $0x68] sm:$0xff] %v225_v22  ;;  %v256_v25 = vadd.f32 %v201_v21, %v199_v17  ;;  %v268_v26 = vadd.f32 %v225_v22, %v223_v19  ;;  %v279_v27 = vmul.f32 %v201_v21, %v201_v21 }
 0x178   :  { %v287_v28 = vmul.f32 %v225_v22, %v225_v22 }
 0x179   :  { %303 = vadd.xlane.f32.xlu0 %v302_v8  ;;  %294 = vadd.xlane.f32.xlu1 %v293_v18  ;;  %v205_v29 = vpop.f32.mrb[6].mxu0  ;;  %v229_v30 = vpop.f32.mrb[6].mxu1  ;;  %v296_v31 = vadd.f32 %v279_v27, %v278_v23 }
 0x17a   :  { %v308_v32 = vadd.f32 %v287_v28, %v286_v24  ;;  %240 = vst [vmem:[%s563_s3 + $0x30] sm:$0xff] %v205_v29  ;;  %v207_v33 = vpop.f32.mrb[7].mxu0  ;;  %248 = vst [vmem:[%s563_s3 + $0x70] sm:$0xff] %v229_v30  ;;  %v231_v34 = vpop.f32.mrb[7].mxu1  ;;  %v280_v35 = vmul.f32 %v205_v29, %v205_v29  ;;  %v288_v36 = vmul.f32 %v229_v30, %v229_v30 }
 0x17b   :  { %241 = vst [vmem:[%s563_s3 + $0x38] sm:$0xff] %v207_v33  ;;  %v281_v37 = vmul.f32 %v207_v33, %v207_v33  ;;  %249 = vst [vmem:[%s563_s3 + $0x78] sm:$0xff] %v231_v34  ;;  %v289_v38 = vmul.f32 %v231_v34, %v231_v34  ;;  %v259_v39 = vadd.f32 %v207_v33, %v205_v29 }
 0x17c   :  { %v271_v40 = vadd.f32 %v231_v34, %v229_v30 }
 0x17d   :  { %306 = vadd.xlane.f32.xlu1 %v305_v20  ;;  %254 = vadd.xlane.f32.xlu0 %v253_v16  ;;  %v299_v41 = vadd.f32 %v281_v37, %v280_v35  ;;  %v311_v42 = vadd.f32 %v289_v38, %v288_v36 }
 0x181   :  { %257 = vadd.xlane.f32.xlu0 %v256_v25  ;;  %260 = vadd.xlane.f32.xlu1 %v259_v39 }
 0x185   :  { %269 = vadd.xlane.f32.xlu0 %v268_v26  ;;  %272 = vadd.xlane.f32.xlu1 %v271_v40 }
 0x189   :  { %297 = vadd.xlane.f32.xlu0 %v296_v31  ;;  %300 = vadd.xlane.f32.xlu1 %v299_v41 }
 0x18d   :  { %309 = vadd.xlane.f32.xlu0 %v308_v32  ;;  %312 = vadd.xlane.f32.xlu1 %v311_v42 }
 0x1fe   :  { %v264_v43 = vpop.xlane.xlu0 %263  ;;  %v252_v44 = vpop.xlane.xlu1 %251 }
 0x202   :  { %v292_v45 = vpop.xlane.xlu0 %291  ;;  %v267_v46 = vpop.xlane.xlu1 %266 }
 0x203   :  { %v315_v47 = vsel %vm314_vm1, %v252_v44, %v292_v45 }
 0x204   :  { %324 = vst.msk [vmem:[%s564_s4] sm:$0xff] %vm323_vm2, %v315_v47 }
 0x206   :  { %v304_v48 = vpop.xlane.xlu0 %303  ;;  %v295_v49 = vpop.xlane.xlu1 %294 }
 0x207   :  { %v319_v50 = vsel %vm314_vm1, %v264_v43, %v304_v48 }
 0x208   :  { %328 = vst.msk [vmem:[%s564_s4 + $0x20] sm:$0xff] %vm323_vm2, %v319_v50 }
 0x20a   :  { %v307_v51 = vpop.xlane.xlu1 %306  ;;  %v255_v52 = vpop.xlane.xlu0 %254 }
 0x20b   :  { %v320_v53 = vsel %vm314_vm1, %v267_v46, %v307_v51  ;;  %v316_v54 = vsel %vm314_vm1, %v255_v52, %v295_v49 }
 0x20c   :  { %329 = vst.msk [vmem:[%s564_s4 + $0x28] sm:$0xff] %vm323_vm2, %v320_v53  ;;  %325 = vst.msk [vmem:[%s564_s4 + $0x8] sm:$0xff] %vm323_vm2, %v316_v54 }
 0x20e   :  { %v258_v55 = vpop.xlane.xlu0 %257  ;;  %v261_v56 = vpop.xlane.xlu1 %260 }
 0x212   :  { %v270_v57 = vpop.xlane.xlu0 %269  ;;  %v273_v58 = vpop.xlane.xlu1 %272 }
 0x216   :  { %v298_v59 = vpop.xlane.xlu0 %297  ;;  %v301_v60 = vpop.xlane.xlu1 %300 }
 0x217   :  { %v317_v61 = vsel %vm314_vm1, %v258_v55, %v298_v59  ;;  %v318_v62 = vsel %vm314_vm1, %v261_v56, %v301_v60 }
 0x218   :  { %326 = vst.msk [vmem:[%s564_s4 + $0x10] sm:$0xff] %vm323_vm2, %v317_v61  ;;  %327 = vst.msk [vmem:[%s564_s4 + $0x18] sm:$0xff] %vm323_vm2, %v318_v62 }
 0x21a   :  { %v310_v63 = vpop.xlane.xlu0 %309  ;;  %v313_v0 = vpop.xlane.xlu1 %312 }
 0x21b   :  { %v321_v1 = vsel %vm314_vm1, %v270_v57, %v310_v63  ;;  %v322_v2 = vsel %vm314_vm1, %v273_v58, %v313_v0 }
 0x21c   :  { %330 = vst.msk [vmem:[%s564_s4 + $0x30] sm:$0xff] %vm323_vm2, %v321_v1  ;;  %331 = vst.msk [vmem:[%s564_s4 + $0x38] sm:$0xff] %vm323_vm2, %v322_v2 }

// kernel: pointnet_cloud_encoder.7
= control target key start
LH: loop header
LB: loop body
LE: loop exit
PB: predicated region body
PF: predicated region fallthrough
CT: control target
= control target key end

     0   :  { %v181_v0 = vmov 0   ;;  %v182_v9 = vmov 1   ;;  %s326_s0 = inlined_call_operand.vmem [shape: f32[64,2], index: 0, kind: input, shape index: {}]   ;;  %s327_s1 = inlined_call_operand.vmem [shape: f32[64,256], index: 1, kind: input, shape index: {}]   ;;  %s328_s2 = inlined_call_operand.vmem [shape: f32[64,256], index: 2, kind: output, shape index: {}]  }
   0x1   :  { %178 = vset.pattern.permute.xlu1 %v181_v0  ;;  %177 = vset.pattern.permute.xlu0 %v181_v0  ;;  %v13_v1 = vld [vmem:[%s326_s0 + $0x10] sm:$0xff]  ;;  %v11_v2 = vld [vmem:[%s326_s0] sm:$0xff]  ;;  %v14_v3 = vld [vmem:[%s326_s0 + $0x18] sm:$0xff] }
   0x2   :  { %47 = vperm.xlu1 %178, %v13_v1   ;;  %37 = vperm.xlu0 %177, %v11_v2   ;;  %v12_v4 = vld [vmem:[%s326_s0 + $0x8] sm:$0xff]  ;;  %v15_v6 = vld [vmem:[%s326_s0 + $0x20] sm:$0xff]  ;;  %v18_v7 = vld [vmem:[%s326_s0 + $0x38] sm:$0xff] }
   0x3   :  { %v16_v5 = vld [vmem:[%s326_s0 + $0x28] sm:$0xff]  ;;  %v17_v8 = vld [vmem:[%s326_s0 + $0x30] sm:$0xff]  ;;  %v19_v16 = vld [vmem:[%s327_s1] sm:$0xff] }
   0x4   :  { %v20_v19 = vld [vmem:[%s327_s1 + $0x8] sm:$0xff]  ;;  %v21_v20 = vld [vmem:[%s327_s1 + $0x10] sm:$0xff]  ;;  %v22_v21 = vld [vmem:[%s327_s1 + $0x18] sm:$0xff] }
   0x5   :  { %v23_v22 = vld [vmem:[%s327_s1 + $0x20] sm:$0xff]  ;;  %v24_v23 = vld [vmem:[%s327_s1 + $0x28] sm:$0xff]  ;;  %v25_v26 = vld [vmem:[%s327_s1 + $0x30] sm:$0xff] }
   0x6   :  { %52 = vperm.xlu1 %178, %v14_v3   ;;  %42 = vperm.xlu0 %177, %v12_v4   ;;  %v26_v27 = vld [vmem:[%s327_s1 + $0x38] sm:$0xff]  ;;  %v29_v40 = vld [vmem:[%s327_s1 + $0x50] sm:$0xff]  ;;  %v27_v42 = vld [vmem:[%s327_s1 + $0x40] sm:$0xff] }
   0x7   :  { %v30_v41 = vld [vmem:[%s327_s1 + $0x58] sm:$0xff]  ;;  %v28_v43 = vld [vmem:[%s327_s1 + $0x48] sm:$0xff]  ;;  %v33_v58 = vld [vmem:[%s327_s1 + $0x70] sm:$0xff] }
   0x8   :  { %v34_v59 = vld [vmem:[%s327_s1 + $0x78] sm:$0xff]  ;;  %v31_v60 = vld [vmem:[%s327_s1 + $0x60] sm:$0xff]  ;;  %v32_v61 = vld [vmem:[%s327_s1 + $0x68] sm:$0xff] }
   0xa   :  { %62 = vperm.xlu1 %178, %v16_v5   ;;  %57 = vperm.xlu0 %177, %v15_v6  }
   0xe   :  { %72 = vperm.xlu1 %178, %v18_v7   ;;  %67 = vperm.xlu0 %177, %v17_v8  }
  0x12   :  { %180 = vset.pattern.permute.xlu1 %v182_v9  ;;  %179 = vset.pattern.permute.xlu0 %v182_v9 }
  0x13   :  { %96 = vperm.xlu1 %180, %v12_v4   ;;  %92 = vperm.xlu0 %179, %v11_v2  }
  0x17   :  { %100 = vperm.xlu1 %180, %v13_v1   ;;  %104 = vperm.xlu0 %179, %v14_v3  }
  0x1b   :  { %108 = vperm.xlu1 %180, %v15_v6   ;;  %112 = vperm.xlu0 %179, %v16_v5  }
  0x1f   :  { %116 = vperm.xlu1 %180, %v17_v8   ;;  %120 = vperm.xlu0 %179, %v18_v7  }
  0x81   :  { %v48_v10 = vpop.permute.xlu1 %47  ;;  %v38_v11 = vpop.permute.xlu0 %37 }
  0x82   :  { %v75_v24 = vmul.f32 %v38_v11, %v19_v16  ;;  %v76_v25 = vmul.f32 %v38_v11, %v20_v19  ;;  %v79_v36 = vmul.f32 %v48_v10, %v23_v22  ;;  %v80_v37 = vmul.f32 %v48_v10, %v24_v23 }
  0x85   :  { %v53_v12 = vpop.permute.xlu1 %52  ;;  %v43_v13 = vpop.permute.xlu0 %42 }
  0x86   :  { %v77_v28 = vmul.f32 %v43_v13, %v21_v20  ;;  %v78_v29 = vmul.f32 %v43_v13, %v22_v21  ;;  %v81_v38 = vmul.f32 %v53_v12, %v25_v26  ;;  %v82_v39 = vmul.f32 %v53_v12, %v26_v27 }
  0x89   :  { %v63_v14 = vpop.permute.xlu1 %62  ;;  %v58_v15 = vpop.permute.xlu0 %57 }
  0x8a   :  { %v85_v54 = vmul.f32 %v63_v14, %v29_v40  ;;  %v86_v55 = vmul.f32 %v63_v14, %v30_v41  ;;  %v83_v56 = vmul.f32 %v58_v15, %v27_v42  ;;  %v84_v57 = vmul.f32 %v58_v15, %v28_v43 }
  0x8d   :  { %v225_v17 = vpop.permute.xlu1 %72  ;;  %v227_v18 = vpop.permute.xlu0 %67 }
  0x8e   :  { %v89_v8 = vmul.f32 %v225_v17, %v33_v58  ;;  %v90_v9 = vmul.f32 %v225_v17, %v34_v59  ;;  %v87_v10 = vmul.f32 %v227_v18, %v31_v60  ;;  %v88_v11 = vmul.f32 %v227_v18, %v32_v61 }
  0x92   :  { %v97_v30 = vpop.permute.xlu1 %96  ;;  %v93_v31 = vpop.permute.xlu0 %92 }
  0x93   :  { %v125_v32 = vadd.f32 %v97_v30, %v77_v28  ;;  %v126_v33 = vadd.f32 %v97_v30, %v78_v29  ;;  %v123_v34 = vadd.f32 %v93_v31, %v75_v24  ;;  %v124_v35 = vadd.f32 %v93_v31, %v76_v25 }
  0x95   :  { %v141_v44 = vmax.f32 %v125_v32, 0.0  ;;  %v142_v45 = vmax.f32 %v126_v33, 0.0  ;;  %v139_v46 = vmax.f32 %v123_v34, 0.0  ;;  %v140_v47 = vmax.f32 %v124_v35, 0.0 }
  0x96   :  { %v101_v48 = vpop.permute.xlu1 %100  ;;  %v105_v49 = vpop.permute.xlu0 %104 }
  0x97   :  { %157 = vst [vmem:[%s328_s2 + $0x10] sm:$0xff] %v141_v44  ;;  %158 = vst [vmem:[%s328_s2 + $0x18] sm:$0xff] %v142_v45  ;;  %v127_v50 = vadd.f32 %v101_v48, %v79_v36  ;;  %v128_v51 = vadd.f32 %v101_v48, %v80_v37  ;;  %v129_v52 = vadd.f32 %v105_v49, %v81_v38 }
  0x98   :  { %155 = vst [vmem:[%s328_s2] sm:$0xff] %v139_v46  ;;  %156 = vst [vmem:[%s328_s2 + $0x8] sm:$0xff] %v140_v47  ;;  %v130_v53 = vadd.f32 %v105_v49, %v82_v39 }
  0x99   :  { %v143_v62 = vmax.f32 %v127_v50, 0.0  ;;  %v144_v63 = vmax.f32 %v128_v51, 0.0  ;;  %v145_v0 = vmax.f32 %v129_v52, 0.0 }
  0x9a   :  { %v146_v1 = vmax.f32 %v130_v53, 0.0  ;;  %v109_v2 = vpop.permute.xlu1 %108  ;;  %v113_v3 = vpop.permute.xlu0 %112 }
  0x9b   :  { %159 = vst [vmem:[%s328_s2 + $0x20] sm:$0xff] %v143_v62  ;;  %160 = vst [vmem:[%s328_s2 + $0x28] sm:$0xff] %v144_v63  ;;  %v131_v4 = vadd.f32 %v109_v2, %v83_v56  ;;  %v132_v5 = vadd.f32 %v109_v2, %v84_v57  ;;  %v133_v6 = vadd.f32 %v113_v3, %v85_v54 }
  0x9c   :  { %161 = vst [vmem:[%s328_s2 + $0x30] sm:$0xff] %v145_v0  ;;  %162 = vst [vmem:[%s328_s2 + $0x38] sm:$0xff] %v146_v1  ;;  %v134_v7 = vadd.f32 %v113_v3, %v86_v55 }
  0x9d   :  { %v147_v12 = vmax.f32 %v131_v4, 0.0  ;;  %v148_v13 = vmax.f32 %v132_v5, 0.0  ;;  %v149_v14 = vmax.f32 %v133_v6, 0.0 }
  0x9e   :  { %v150_v15 = vmax.f32 %v134_v7, 0.0  ;;  %v117_v16 = vpop.permute.xlu1 %116  ;;  %v121_v19 = vpop.permute.xlu0 %120 }
  0x9f   :  { %163 = vst [vmem:[%s328_s2 + $0x40] sm:$0xff] %v147_v12  ;;  %164 = vst [vmem:[%s328_s2 + $0x48] sm:$0xff] %v148_v13  ;;  %v135_v17 = vadd.f32 %v117_v16, %v87_v10  ;;  %v136_v18 = vadd.f32 %v117_v16, %v88_v11  ;;  %v137_v20 = vadd.f32 %v121_v19, %v89_v8 }
  0xa0   :  { %165 = vst [vmem:[%s328_s2 + $0x50] sm:$0xff] %v149_v14  ;;  %166 = vst [vmem:[%s328_s2 + $0x58] sm:$0xff] %v150_v15  ;;  %v138_v21 = vadd.f32 %v121_v19, %v90_v9 }
  0xa1   :  { %v151_v22 = vmax.f32 %v135_v17, 0.0  ;;  %v152_v23 = vmax.f32 %v136_v18, 0.0  ;;  %v153_v24 = vmax.f32 %v137_v20, 0.0 }
  0xa2   :  { %v154_v25 = vmax.f32 %v138_v21, 0.0 }
  0xa3   :  { %167 = vst [vmem:[%s328_s2 + $0x60] sm:$0xff] %v151_v22  ;;  %168 = vst [vmem:[%s328_s2 + $0x68] sm:$0xff] %v152_v23 }
  0xa4   :  { %169 = vst [vmem:[%s328_s2 + $0x70] sm:$0xff] %v153_v24  ;;  %170 = vst [vmem:[%s328_s2 + $0x78] sm:$0xff] %v154_v25 }

</bundles_post_ra>
